<compile_context>
chip_gen: v7x
topology: tpu7x:2x2x1
jax: 0.10.0
libtpu: 0.0.40
codegen_flags: <defaults>
</compile_context>

<pallas_src>
import jax
import jax.numpy as jnp
from jax.experimental import pallas as pl
from jax.experimental.pallas import tpu as pltpu

LANE = 128
HIDDEN = 128
IN_FEATURES = 4


def _round_up(n: int, m: int) -> int:
    return (n + m - 1) // m * m


def qnet_kernel(x_ref, w1_ref, b1_ref, w2_ref, b2_ref, o_ref):
    # ---- fc1 on the VPU: K=4 contraction as 4 broadcast multiply-adds ----
    x = x_ref[...]                                     # (Bt, 4)   f32
    w1 = w1_ref[...]                                   # (4, 128)  f32
    h = jnp.broadcast_to(b1_ref[...], (x.shape[0], HIDDEN))  # (Bt, 128) f32
    for k in range(IN_FEATURES):                       # static unroll
        h = h + x[:, k:k + 1] * w1[k:k + 1, :]
    h = jnp.maximum(h, 0.0)                            # ReLU, f32 on VPU

    # ---- fc2 on the MXU: K=128 native shape, bf16 in / f32 accumulate ----
    out = jnp.dot(h.astype(jnp.bfloat16), w2_ref[...],
                  preferred_element_type=jnp.float32)  # (Bt, 128) lane-dense
    out = out + b2_ref[...]                            # (1, 128) broadcast
    o_ref[...] = out.astype(o_ref.dtype)


@jax.jit
def qnet_forward(x, w1, b1, w2, b2):
    B = x.shape[0]
    A = w2.shape[1]
    A_pad = _round_up(max(A, 1), LANE)

    # Lane-dense output: zero-pad the action dim up to 128 columns.
    w2_p = jnp.zeros((HIDDEN, A_pad), jnp.bfloat16).at[:, :A].set(
        w2.astype(jnp.bfloat16))
    b2_p = jnp.zeros((1, A_pad), jnp.float32).at[:, :A].set(
        b2.reshape(1, A).astype(jnp.float32))

    # Batch tiling: whole batch when small; 256-row tiles for training-sized
    # batches (parallel axis -> sharded across both TensorCores on v7x).
    Bt = 256 if B >= 256 else _round_up(B, 8)
    B_pad = _round_up(B, Bt)
    x_p = x if B_pad == B else jnp.pad(x, ((0, B_pad - B), (0, 0)))

    out = pl.pallas_call(
        qnet_kernel,
        out_shape=jax.ShapeDtypeStruct((B_pad, A_pad), jnp.float32),
        grid=(B_pad // Bt,),
        in_specs=[
            pl.BlockSpec((Bt, IN_FEATURES), lambda i: (i, 0)),      # x
            pl.BlockSpec((IN_FEATURES, HIDDEN), lambda i: (0, 0)),  # w1
            pl.BlockSpec((1, HIDDEN), lambda i: (0, 0)),            # b1
            pl.BlockSpec((HIDDEN, A_pad), lambda i: (0, 0)),        # w2 (bf16)
            pl.BlockSpec((1, A_pad), lambda i: (0, 0)),             # b2
        ],
        out_specs=pl.BlockSpec((Bt, A_pad), lambda i: (i, 0)),
        compiler_params=pltpu.CompilerParams(
            dimension_semantics=("parallel",)),
        cost_estimate=pl.CostEstimate(
            flops=2 * B_pad * (IN_FEATURES * HIDDEN + HIDDEN * A_pad),
            transcendentals=0,
            bytes_accessed=(x_p.size * 4 + w1.size * 4 + b1.size * 4
                            + w2_p.size * 2 + b2_p.size * 4
                            + B_pad * A_pad * 4),
        ),
    )(x_p, w1, b1, w2_p, b2_p)

    return out[:B, :A]


def init_params(key, action_size: int):
    """Deterministic init matching PyTorch nn.Linear shapes / distribution.

    PyTorch nn.Linear(in, out) default init: U(-1/sqrt(in), 1/sqrt(in)) for
    both weight and bias. Weights are stored transposed (in, out) so the
    kernel computes x @ W + b without a transpose. w2 is kept in bf16
    (halves weight DMA; f32 MXU accumulation preserved in the kernel).
    """
    k1, k2, k3, k4 = jax.random.split(key, 4)
    in1, out1 = IN_FEATURES, HIDDEN
    in2, out2 = HIDDEN, action_size
    bound1 = 1.0 / jnp.sqrt(in1)
    bound2 = 1.0 / jnp.sqrt(in2)
    w1 = jax.random.uniform(k1, (in1, out1), jnp.float32, -bound1, bound1)
    b1 = jax.random.uniform(k2, (1, out1), jnp.float32, -bound1, bound1)
    w2 = jax.random.uniform(k3, (in2, out2), jnp.float32,
                            -bound2, bound2).astype(jnp.bfloat16)
    b2 = jax.random.uniform(k4, (1, out2), jnp.float32, -bound2, bound2)
    return w1, b1, w2, b2


def reference_forward(x, w1, b1, w2, b2):
    h = jnp.maximum(x @ w1 + b1, 0.0)
    out = jnp.dot(h.astype(jnp.bfloat16), w2,
                  preferred_element_type=jnp.float32)
    return out + b2


if __name__ == "__main__":
    key = jax.random.PRNGKey(0)
    kx, kp = jax.random.split(key)

    action_size = 2           # e.g. CartPole
    batch = 8
    x = jax.random.normal(kx, (batch, IN_FEATURES), jnp.float32)

    w1, b1, w2, b2 = init_params(kp, action_size)

    out = qnet_forward(x, w1, b1, w2, b2)
    out = jax.block_until_ready(out)

    ref = reference_forward(x, w1, b1, w2, b2)
    assert out.shape == (batch, action_size)
    assert jnp.allclose(out, ref, atol=1e-3, rtol=1e-3), "mismatch vs reference"

    print("KERNEL_OK")
</pallas_src>

<mosaic_0001>
module attributes {stable_mosaic.version = 11 : i64} {
  func.func @qnet_kernel(%arg0: i32, %arg1: memref<8x4xf32, #tpu.memory_space<vmem>>, %arg2: memref<4x128xf32, #tpu.memory_space<vmem>>, %arg3: memref<1x128xf32, #tpu.memory_space<vmem>>, %arg4: memref<128x128xbf16, #tpu.memory_space<vmem>>, %arg5: memref<1x128xf32, #tpu.memory_space<vmem>>, %arg6: memref<8x128xf32, #tpu.memory_space<vmem>>) attributes {dimension_semantics = [#tpu.dimension_semantics<parallel>], iteration_bounds = array<i64: 1>, scalar_prefetch = 0 : i64, scratch_operands = 0 : i64, tpu.core_type = #tpu.core_type<tc>, window_params = [{transform_indices = @transform_0, window_bounds = array<i64: 8, 4>}, {pipeline_mode = #tpu.pipeline_mode<synchronous>, transform_indices = @transform_1, window_bounds = array<i64: 4, 128>}, {pipeline_mode = #tpu.pipeline_mode<synchronous>, transform_indices = @transform_2, window_bounds = array<i64: 1, 128>}, {pipeline_mode = #tpu.pipeline_mode<synchronous>, transform_indices = @transform_3, window_bounds = array<i64: 128, 128>}, {pipeline_mode = #tpu.pipeline_mode<synchronous>, transform_indices = @transform_4, window_bounds = array<i64: 1, 128>}, {transform_indices = @transform_5, window_bounds = array<i64: 8, 128>}]} {
    %c0 = arith.constant 0 : index
    %c0_0 = arith.constant 0 : index
    %0 = vector.load %arg1[%c0, %c0_0] : memref<8x4xf32, #tpu.memory_space<vmem>>, vector<8x4xf32>
    %c0_1 = arith.constant 0 : index
    %c0_2 = arith.constant 0 : index
    %1 = vector.load %arg2[%c0_1, %c0_2] : memref<4x128xf32, #tpu.memory_space<vmem>>, vector<4x128xf32>
    %c0_3 = arith.constant 0 : index
    %c0_4 = arith.constant 0 : index
    %2 = vector.load %arg3[%c0_3, %c0_4] : memref<1x128xf32, #tpu.memory_space<vmem>>, vector<1x128xf32>
    %3 = vector.shape_cast %2 : vector<1x128xf32> to vector<1x128xf32>
    %4 = vector.broadcast %3 : vector<1x128xf32> to vector<8x128xf32>
    %5 = vector.extract_strided_slice %0 {offsets = [0, 0], sizes = [8, 1], strides = [1, 1]} : vector<8x4xf32> to vector<8x1xf32>
    %6 = vector.extract_strided_slice %1 {offsets = [0, 0], sizes = [1, 128], strides = [1, 1]} : vector<4x128xf32> to vector<1x128xf32>
    %7 = vector.broadcast %5 : vector<8x1xf32> to vector<8x128xf32>
    %8 = vector.broadcast %6 : vector<1x128xf32> to vector<8x128xf32>
    %9 = arith.mulf %7, %8 : vector<8x128xf32>
    %10 = arith.addf %4, %9 : vector<8x128xf32>
    %11 = vector.extract_strided_slice %0 {offsets = [0, 1], sizes = [8, 1], strides = [1, 1]} : vector<8x4xf32> to vector<8x1xf32>
    %12 = vector.extract_strided_slice %1 {offsets = [1, 0], sizes = [1, 128], strides = [1, 1]} : vector<4x128xf32> to vector<1x128xf32>
    %13 = vector.broadcast %11 : vector<8x1xf32> to vector<8x128xf32>
    %14 = vector.broadcast %12 : vector<1x128xf32> to vector<8x128xf32>
    %15 = arith.mulf %13, %14 : vector<8x128xf32>
    %16 = arith.addf %10, %15 : vector<8x128xf32>
    %17 = vector.extract_strided_slice %0 {offsets = [0, 2], sizes = [8, 1], strides = [1, 1]} : vector<8x4xf32> to vector<8x1xf32>
    %18 = vector.extract_strided_slice %1 {offsets = [2, 0], sizes = [1, 128], strides = [1, 1]} : vector<4x128xf32> to vector<1x128xf32>
    %19 = vector.broadcast %17 : vector<8x1xf32> to vector<8x128xf32>
    %20 = vector.broadcast %18 : vector<1x128xf32> to vector<8x128xf32>
    %21 = arith.mulf %19, %20 : vector<8x128xf32>
    %22 = arith.addf %16, %21 : vector<8x128xf32>
    %23 = vector.extract_strided_slice %0 {offsets = [0, 3], sizes = [8, 1], strides = [1, 1]} : vector<8x4xf32> to vector<8x1xf32>
    %24 = vector.extract_strided_slice %1 {offsets = [3, 0], sizes = [1, 128], strides = [1, 1]} : vector<4x128xf32> to vector<1x128xf32>
    %25 = vector.broadcast %23 : vector<8x1xf32> to vector<8x128xf32>
    %26 = vector.broadcast %24 : vector<1x128xf32> to vector<8x128xf32>
    %27 = arith.mulf %25, %26 : vector<8x128xf32>
    %28 = arith.addf %22, %27 : vector<8x128xf32>
    %cst = arith.constant 0.000000e+00 : f32
    %29 = vector.broadcast %cst : f32 to vector<8x128xf32>
    %30 = arith.maximumf %28, %29 : vector<8x128xf32>
    %31 = arith.truncf %30 : vector<8x128xf32> to vector<8x128xbf16>
    %c0_5 = arith.constant 0 : index
    %c0_6 = arith.constant 0 : index
    %32 = vector.load %arg4[%c0_5, %c0_6] : memref<128x128xbf16, #tpu.memory_space<vmem>>, vector<128x128xbf16>
    %cst_7 = arith.constant dense<0.000000e+00> : vector<8x128xf32>
    %33 = tpu.matmul %31, %32, %cst_7 {dimension_numbers = #tpu.dot_dimension_numbers<[1], [0], [0], [1], [0, 0, 1, 1], [], []>} : vector<8x128xbf16>, vector<128x128xbf16>, vector<8x128xf32> -> vector<8x128xf32>
    %c0_8 = arith.constant 0 : index
    %c0_9 = arith.constant 0 : index
    %34 = vector.load %arg5[%c0_8, %c0_9] : memref<1x128xf32, #tpu.memory_space<vmem>>, vector<1x128xf32>
    %35 = vector.broadcast %34 : vector<1x128xf32> to vector<8x128xf32>
    %36 = arith.addf %33, %35 : vector<8x128xf32>
    %c0_10 = arith.constant 0 : index
    %c0_11 = arith.constant 0 : index
    %37 = vector.load %arg6[%c0_10, %c0_11] : memref<8x128xf32, #tpu.memory_space<vmem>>, vector<8x128xf32>
    tpu.vector_store %arg6[%c0_10, %c0_11], %36 {strides = array<i32>} : memref<8x128xf32, #tpu.memory_space<vmem>>, vector<8x128xf32>,
    return
  }
  func.func @transform_0(%arg0: i32) -> (i32, i32) {
    %c0_i32 = arith.constant 0 : i32
    %c0_i32_0 = arith.constant 0 : i32
    return %arg0, %c0_i32 : i32, i32
  }
  func.func @transform_1(%arg0: i32) -> (i32, i32) {
    %c0_i32 = arith.constant 0 : i32
    %c0_i32_0 = arith.constant 0 : i32
    %c0_i32_1 = arith.constant 0 : i32
    return %c0_i32, %c0_i32_0 : i32, i32
  }
  func.func @transform_2(%arg0: i32) -> (i32, i32) {
    %c0_i32 = arith.constant 0 : i32
    %c0_i32_0 = arith.constant 0 : i32
    %c0_i32_1 = arith.constant 0 : i32
    return %c0_i32, %c0_i32_0 : i32, i32
  }
  func.func @transform_3(%arg0: i32) -> (i32, i32) {
    %c0_i32 = arith.constant 0 : i32
    %c0_i32_0 = arith.constant 0 : i32
    %c0_i32_1 = arith.constant 0 : i32
    return %c0_i32, %c0_i32_0 : i32, i32
  }
  func.func @transform_4(%arg0: i32) -> (i32, i32) {
    %c0_i32 = arith.constant 0 : i32
    %c0_i32_0 = arith.constant 0 : i32
    %c0_i32_1 = arith.constant 0 : i32
    return %c0_i32, %c0_i32_0 : i32, i32
  }
  func.func @transform_5(%arg0: i32) -> (i32, i32) {
    %c0_i32 = arith.constant 0 : i32
    %c0_i32_0 = arith.constant 0 : i32
    return %arg0, %c0_i32 : i32, i32
  }
}

</mosaic_0001>

<bundles_post_ra>
// kernel: qnet_forward.1
= control target key start
LH: loop header
LB: loop body
LE: loop exit
PB: predicated region body
PF: predicated region fallthrough
CT: control target
= control target key end

     0   :  { %v247_v0 = vmov 0   ;;  %v248_v2 = vmov 2   ;;  %v249_v4 = vmov 0.0   ;;  %v250_v6 = vmov 1   ;;  %s322_s0 = inlined_call_operand.vmem [shape: f32[8,4], index: 0, kind: input, shape index: {}]   ;;  %s323_s3 = inlined_call_operand.vmem [shape: bf16[128,128], index: 3, kind: input, shape index: {}]   ;;  %s324_s1 = inlined_call_operand.vmem [shape: f32[4,128], index: 1, kind: input, shape index: {}]   ;;  %s325_s2 = inlined_call_operand.vmem [shape: f32[1,128], index: 2, kind: input, shape index: {}]   ;;  %s326_s4 = inlined_call_operand.vmem [shape: f32[1,128], index: 4, kind: input, shape index: {}]   ;;  %s327_s5 = inlined_call_operand.vmem [shape: f32[8,128], index: 5, kind: output, shape index: {}]  }
   0x1   :  { %234 = vset.pattern.permute.xlu0 %v247_v0  ;;  %v21_v1 = vld [vmem:[%s322_s0] sm:$0xff]  ;;  %236 = vset.pattern.permute.xlu1 %v248_v2  ;;  %v240_v5 = vld [vmem:[%s323_s3 + $0x8] sm:$0xff]   ;;  %v251_v7 = vmov 3   ;;  %v241_v8 = vld [vmem:[%s323_s3 + $0x10] sm:$0xff]   ;;  %vm252_vm0 = vmmov 0   ;;  %v35_v14 = vlaneseq }
   0x2   :  { %32 = vperm.xlu0 %234, %v21_v1   ;;  %52 = vperm.xlu1 %236, %v21_v1   ;;  %v239_v3 = vld [vmem:[%s323_s3] sm:$0xff]   ;;  %v242_v9 = vld [vmem:[%s323_s3 + $0x18] sm:$0xff]   ;;  %v244_v11 = vld [vmem:[%s323_s3 + $0x28] sm:$0xff]  }
   0x3   :  { %208 = vmatprep.subr.bf16.mxu0 %v249_v4  ;;  %v243_v10 = vld [vmem:[%s323_s3 + $0x20] sm:$0xff]   ;;  %224 = vmatprep.mubr.msk.bf16.mxu0 %vm252_vm0, %v249_v4  ;;  %v245_v12 = vld [vmem:[%s323_s3 + $0x30] sm:$0xff]   ;;  %v246_v13 = vld [vmem:[%s323_s3 + $0x38] sm:$0xff]   ;;  %v36_v15 = vshrl.u32 %v35_v14, 7 }
   0x4   :  { %209 = vmatpush3.bf16.msra.mxu0 %v239_v3  ;;  %v22_v17 = vld [vmem:[%s324_s1] sm:$0xf] }
   0x5   :  { %210 = vmatprep.subr.bf16.mxu0 %v249_v4  ;;  %v37_v16 = vsub.s32 0, %v36_v15  ;;  %v47_v19 = vsub.s32 1, %v36_v15  ;;  %v57_v21 = vsub.s32 2, %v36_v15  ;;  %v67_v23 = vsub.s32 3, %v36_v15  ;;  %v189_v26 = vld [vmem:[%s325_s2] ss:$0 sm:$0xff] }
   0x6   :  { %235 = vset.pattern.permute.xlu0 %v250_v6  ;;  %237 = vset.pattern.permute.xlu1 %v251_v7  ;;  %v190_v40 = vld [vmem:[%s326_s4] ss:$0 sm:$0xff] }
   0x7   :  { %42 = vperm.xlu0 %235, %v21_v1   ;;  %62 = vperm.xlu1 %237, %v21_v1   ;;  %v38_v18 = vrot.slane %v22_v17, %v37_v16  ;;  %v48_v25 = vrot.slane %v22_v17, %v47_v19  ;;  %v58_v27 = vrot.slane %v22_v17, %v57_v21 }
   0x8   :  { %211 = vmatpush3.bf16.msra.mxu0 %v240_v5  ;;  %v68_v28 = vrot.slane %v22_v17, %v67_v23 }
   0x9   :  { %212 = vmatprep.subr.bf16.mxu0 %v249_v4 }
   0xb   :  { %238 = vset.pattern.permute.xlu0 %v251_v7 }
   0xc   :  { %213 = vmatpush3.bf16.msra.mxu0 %v241_v8 }
   0xd   :  { %214 = vmatprep.subr.bf16.mxu0 %v249_v4 }
  0x10   :  { %215 = vmatpush3.bf16.msra.mxu0 %v242_v9 }
  0x11   :  { %216 = vmatprep.subr.bf16.mxu0 %v249_v4 }
  0x14   :  { %217 = vmatpush3.bf16.msra.mxu0 %v243_v10 }
  0x15   :  { %218 = vmatprep.subr.bf16.mxu0 %v249_v4 }
  0x18   :  { %219 = vmatpush3.bf16.msra.mxu0 %v244_v11 }
  0x19   :  { %220 = vmatprep.subr.bf16.mxu0 %v249_v4 }
  0x1c   :  { %221 = vmatpush3.bf16.msra.mxu0 %v245_v12 }
  0x1d   :  { %222 = vmatprep.subr.bf16.mxu0 %v249_v4 }
  0x20   :  { %223 = vmatpush3.bf16.msra.mxu0 %v246_v13 }
  0x81   :  { %v33_v20 = vpop.permute.xlu0 %32  ;;  %v53_v22 = vpop.permute.xlu1 %52 }
  0x82   :  { %v39_v24 = vmul.f32 %v38_v18, %v33_v20  ;;  %v59_v33 = vmul.f32 %v58_v27, %v53_v22 }
  0x84   :  { %v40_v31 = vadd.f32 %v189_v26, %v39_v24 }
  0x86   :  { %v43_v29 = vpop.permute.xlu0 %42  ;;  %v63_v30 = vpop.permute.xlu1 %62 }
  0x87   :  { %v49_v32 = vmul.f32 %v48_v25, %v43_v29  ;;  %v69_v35 = vmul.f32 %v68_v28, %v63_v30 }
  0x89   :  { %v50_v34 = vadd.f32 %v49_v32, %v40_v31 }
  0x8b   :  { %v60_v36 = vadd.f32 %v59_v33, %v50_v34 }
  0x8d   :  { %v70_v37 = vadd.f32 %v69_v35, %v60_v36 }
  0x8f   :  { %v71_v38 = vmax.f32 %v70_v37, 0.0 }
  0x91   :  { %v72_v39 = vpack.c.bf16 %v71_v38, %v71_v38 }
  0x93   :  { %225 = vmatmul.mubr.bf16.vlgmr.msra.gmra.mrb[0].mxu0 %v72_v39 }
 0x166   :  { %v178_v41 = vpop.f32.mrb[0].mxu0 }
 0x167   :  { %v179_v42 = vadd.f32 %v190_v40, %v178_v41  ;;  %v226_v43 = vpop.f32.mrb[1].mxu0 }
 0x168   :  { %v181_v44 = vpop.f32.mrb[2].mxu0 }
 0x169   :  { %184 = vst [vmem:[%s327_s5] sm:$0xff] %v179_v42  ;;  %v227_v45 = vpop.f32.mrb[3].mxu0 }

</bundles_post_ra>
